<compile_context>
chip_gen: v6e
topology: v6e:2x2x1
jax: 0.10.0
libtpu: 0.0.40
codegen_flags: <defaults>
</compile_context>

<pallas_src>
import jax
import jax.numpy as jnp
from jax.experimental import pallas as pl
from jax.experimental.pallas import tpu as pltpu

IN_SIZE = 8
H1 = 16
H2 = 8
OUT_SIZE = 2

# Default rows per batch tile for the gridded path. 2048 rows -> x tile padded to
# (2048, 128) f32 = 4 MiB... actually 1 MiB (2048*128*4), out tile (8, 2048) f32 = 64 KiB;
# x2 for double buffering stays well under the 32 MiB scoped VMEM limit on every gen.
DEFAULT_TILE_ROWS = 2048


def _round_up(x, m):
    return (x + m - 1) // m * m


def mlp_kernel(x_ref, w1_ref, b1_ref, w2_ref, b2_ref, w3_ref, b3_ref, o_ref):
    # One batch tile: three fused matmuls (MXU) + bias/ReLU (VPU), f32 accumulation.
    x = x_ref[...]

    h1 = jnp.dot(x, w1_ref[...], preferred_element_type=jnp.float32) + b1_ref[...]
    h1 = jnp.maximum(h1, 0.0)

    h2 = jnp.dot(h1, w2_ref[...], preferred_element_type=jnp.float32) + b2_ref[...]
    h2 = jnp.maximum(h2, 0.0)

    h3 = jnp.dot(h2, w3_ref[...], preferred_element_type=jnp.float32) + b3_ref[...]

    # Lane-dense store: (TM, 2) -> (2, TM) so batch sits on the 128-wide lane axis.
    o_ref[...] = h3.T.astype(o_ref.dtype)


def confidence_model_forward(x, params, *, tile_rows=DEFAULT_TILE_ROWS):
    """Forward pass.  x: (B, 8) float32 -> (B, 2) float32."""
    w1, b1, w2, b2, w3, b3 = params
    B = x.shape[0]

    if B <= tile_rows:
        # Single grid step: blocks equal the (sublane-padded) full arrays, so the
        # (8, 128) divisibility constraint is trivially satisfied.
        tm = _round_up(max(B, 1), 8)
        b_pad = tm
    else:
        # Multi-tile grid: TM is the lane dim of the (2, TM) output block -> multiple of 128.
        tm = _round_up(tile_rows, 128)
        b_pad = _round_up(B, tm)

    if b_pad != B:
        x = jnp.pad(x, ((0, b_pad - B), (0, 0)))

    grid = (b_pad // tm,)

    out_t = pl.pallas_call(
        mlp_kernel,
        out_shape=jax.ShapeDtypeStruct((OUT_SIZE, b_pad), jnp.float32),
        grid=grid,
        in_specs=[
            pl.BlockSpec((tm, IN_SIZE), lambda i: (i, 0)),      # x: tiled over batch
            pl.BlockSpec((IN_SIZE, H1), lambda i: (0, 0)),      # w1 (resident)
            pl.BlockSpec((1, H1), lambda i: (0, 0)),            # b1
            pl.BlockSpec((H1, H2), lambda i: (0, 0)),           # w2
            pl.BlockSpec((1, H2), lambda i: (0, 0)),            # b2
            pl.BlockSpec((H2, OUT_SIZE), lambda i: (0, 0)),     # w3
            pl.BlockSpec((1, OUT_SIZE), lambda i: (0, 0)),      # b3
        ],
        # Lane-dense output block: batch on lanes, OUT_SIZE (=2) on sublanes.
        out_specs=pl.BlockSpec((OUT_SIZE, tm), lambda i: (0, i)),
        compiler_params=pltpu.CompilerParams(
            dimension_semantics=("parallel",),       # shard batch across TCs on v7x
            vmem_limit_bytes=32 * 1024 * 1024,       # explicit; safe on v5e/v6e/v7x
        ),
    )(x, w1, b1, w2, b2, w3, b3)

    # (2, B_pad) -> (B, 2); drop padded rows.
    return out_t[:, :B].T


def init_params(key):
    # Deterministic init mimicking nn.Linear default (uniform +- 1/sqrt(fan_in)).
    def linear(k, fan_in, fan_out):
        kw, kb = jax.random.split(k)
        bound = 1.0 / jnp.sqrt(fan_in)
        w = jax.random.uniform(kw, (fan_in, fan_out), jnp.float32, -bound, bound)
        b = jax.random.uniform(kb, (1, fan_out), jnp.float32, -bound, bound)
        return w, b

    k1, k2, k3 = jax.random.split(key, 3)
    w1, b1 = linear(k1, IN_SIZE, H1)
    w2, b2 = linear(k2, H1, H2)
    w3, b3 = linear(k3, H2, OUT_SIZE)
    return (w1, b1, w2, b2, w3, b3)


def reference_forward(x, params):
    w1, b1, w2, b2, w3, b3 = params
    h = jnp.maximum(x @ w1 + b1, 0.0)
    h = jnp.maximum(h @ w2 + b2, 0.0)
    return h @ w3 + b3


if __name__ == "__main__":
    key = jax.random.PRNGKey(0)
    k_param, k_x1, k_x2 = jax.random.split(key, 3)

    params = init_params(k_param)

    # 1) Small-batch smoke test (single grid step, full blocks).
    batch = 8
    x_small = jax.random.normal(k_x1, (batch, IN_SIZE), jnp.float32)
    out_small = jax.block_until_ready(confidence_model_forward(x_small, params))
    ref_small = reference_forward(x_small, params)
    assert out_small.shape == (batch, OUT_SIZE)
    assert jnp.allclose(out_small, ref_small, atol=1e-5, rtol=1e-5)

    # 2) Ragged batch exercising the tiled/padded grid path (B % TM != 0).
    batch2 = 300
    x_big = jax.random.normal(k_x2, (batch2, IN_SIZE), jnp.float32)
    out_big = jax.block_until_ready(
        confidence_model_forward(x_big, params, tile_rows=128)
    )
    ref_big = reference_forward(x_big, params)
    assert out_big.shape == (batch2, OUT_SIZE)
    assert jnp.allclose(out_big, ref_big, atol=1e-5, rtol=1e-5)

    print("KERNEL_OK")
</pallas_src>

<mosaic_0001>
module attributes {stable_mosaic.version = 11 : i64} {
  func.func @mlp_kernel(%arg0: i32, %arg1: memref<8x8xf32, #tpu.memory_space<vmem>>, %arg2: memref<8x16xf32, #tpu.memory_space<vmem>>, %arg3: memref<1x16xf32, #tpu.memory_space<vmem>>, %arg4: memref<16x8xf32, #tpu.memory_space<vmem>>, %arg5: memref<1x8xf32, #tpu.memory_space<vmem>>, %arg6: memref<8x2xf32, #tpu.memory_space<vmem>>, %arg7: memref<1x2xf32, #tpu.memory_space<vmem>>, %arg8: memref<2x8xf32, #tpu.memory_space<vmem>>) attributes {dimension_semantics = [#tpu.dimension_semantics<parallel>], iteration_bounds = array<i64: 1>, scalar_prefetch = 0 : i64, scratch_operands = 0 : i64, tpu.core_type = #tpu.core_type<tc>, window_params = [{transform_indices = @transform_0, window_bounds = array<i64: 8, 8>}, {pipeline_mode = #tpu.pipeline_mode<synchronous>, transform_indices = @transform_1, window_bounds = array<i64: 8, 16>}, {pipeline_mode = #tpu.pipeline_mode<synchronous>, transform_indices = @transform_2, window_bounds = array<i64: 1, 16>}, {pipeline_mode = #tpu.pipeline_mode<synchronous>, transform_indices = @transform_3, window_bounds = array<i64: 16, 8>}, {pipeline_mode = #tpu.pipeline_mode<synchronous>, transform_indices = @transform_4, window_bounds = array<i64: 1, 8>}, {pipeline_mode = #tpu.pipeline_mode<synchronous>, transform_indices = @transform_5, window_bounds = array<i64: 8, 2>}, {pipeline_mode = #tpu.pipeline_mode<synchronous>, transform_indices = @transform_6, window_bounds = array<i64: 1, 2>}, {transform_indices = @transform_7, window_bounds = array<i64: 2, 8>}]} {
    %c0 = arith.constant 0 : index
    %c0_0 = arith.constant 0 : index
    %0 = vector.load %arg1[%c0, %c0_0] : memref<8x8xf32, #tpu.memory_space<vmem>>, vector<8x8xf32>
    %c0_1 = arith.constant 0 : index
    %c0_2 = arith.constant 0 : index
    %1 = vector.load %arg2[%c0_1, %c0_2] : memref<8x16xf32, #tpu.memory_space<vmem>>, vector<8x16xf32>
    %cst = arith.constant dense<0.000000e+00> : vector<8x16xf32>
    %2 = tpu.matmul %0, %1, %cst {dimension_numbers = #tpu.dot_dimension_numbers<[1], [0], [0], [1], [0, 0, 1, 1], [], []>} : vector<8x8xf32>, vector<8x16xf32>, vector<8x16xf32> -> vector<8x16xf32>
    %c0_3 = arith.constant 0 : index
    %c0_4 = arith.constant 0 : index
    %3 = vector.load %arg3[%c0_3, %c0_4] : memref<1x16xf32, #tpu.memory_space<vmem>>, vector<1x16xf32>
    %4 = vector.broadcast %3 : vector<1x16xf32> to vector<8x16xf32>
    %5 = arith.addf %2, %4 : vector<8x16xf32>
    %cst_5 = arith.constant 0.000000e+00 : f32
    %6 = vector.broadcast %cst_5 : f32 to vector<8x16xf32>
    %7 = arith.maximumf %5, %6 : vector<8x16xf32>
    %c0_6 = arith.constant 0 : index
    %c0_7 = arith.constant 0 : index
    %8 = vector.load %arg4[%c0_6, %c0_7] : memref<16x8xf32, #tpu.memory_space<vmem>>, vector<16x8xf32>
    %cst_8 = arith.constant dense<0.000000e+00> : vector<8x8xf32>
    %9 = tpu.matmul %7, %8, %cst_8 {dimension_numbers = #tpu.dot_dimension_numbers<[1], [0], [0], [1], [0, 0, 1, 1], [], []>} : vector<8x16xf32>, vector<16x8xf32>, vector<8x8xf32> -> vector<8x8xf32>
    %c0_9 = arith.constant 0 : index
    %c0_10 = arith.constant 0 : index
    %10 = vector.load %arg5[%c0_9, %c0_10] : memref<1x8xf32, #tpu.memory_space<vmem>>, vector<1x8xf32>
    %11 = vector.broadcast %10 : vector<1x8xf32> to vector<8x8xf32>
    %12 = arith.addf %9, %11 : vector<8x8xf32>
    %cst_11 = arith.constant 0.000000e+00 : f32
    %13 = vector.broadcast %cst_11 : f32 to vector<8x8xf32>
    %14 = arith.maximumf %12, %13 : vector<8x8xf32>
    %c0_12 = arith.constant 0 : index
    %c0_13 = arith.constant 0 : index
    %15 = vector.load %arg6[%c0_12, %c0_13] : memref<8x2xf32, #tpu.memory_space<vmem>>, vector<8x2xf32>
    %cst_14 = arith.constant dense<0.000000e+00> : vector<8x2xf32>
    %16 = tpu.matmul %14, %15, %cst_14 {dimension_numbers = #tpu.dot_dimension_numbers<[1], [0], [0], [1], [0, 0, 1, 1], [], []>} : vector<8x8xf32>, vector<8x2xf32>, vector<8x2xf32> -> vector<8x2xf32>
    %c0_15 = arith.constant 0 : index
    %c0_16 = arith.constant 0 : index
    %17 = vector.load %arg7[%c0_15, %c0_16] : memref<1x2xf32, #tpu.memory_space<vmem>>, vector<1x2xf32>
    %18 = vector.broadcast %17 : vector<1x2xf32> to vector<8x2xf32>
    %19 = arith.addf %16, %18 : vector<8x2xf32>
    %20 = tpu.transpose %19, [1, 0] : vector<8x2xf32> -> vector<2x8xf32>
    %c0_17 = arith.constant 0 : index
    %c0_18 = arith.constant 0 : index
    %21 = vector.load %arg8[%c0_17, %c0_18] : memref<2x8xf32, #tpu.memory_space<vmem>>, vector<2x8xf32>
    tpu.vector_store %arg8[%c0_17, %c0_18], %20 {strides = array<i32>} : memref<2x8xf32, #tpu.memory_space<vmem>>, vector<2x8xf32>,
    return
  }
  func.func @transform_0(%arg0: i32) -> (i32, i32) {
    %c0_i32 = arith.constant 0 : i32
    %c0_i32_0 = arith.constant 0 : i32
    return %arg0, %c0_i32 : i32, i32
  }
  func.func @transform_1(%arg0: i32) -> (i32, i32) {
    %c0_i32 = arith.constant 0 : i32
    %c0_i32_0 = arith.constant 0 : i32
    %c0_i32_1 = arith.constant 0 : i32
    return %c0_i32, %c0_i32_0 : i32, i32
  }
  func.func @transform_2(%arg0: i32) -> (i32, i32) {
    %c0_i32 = arith.constant 0 : i32
    %c0_i32_0 = arith.constant 0 : i32
    %c0_i32_1 = arith.constant 0 : i32
    return %c0_i32, %c0_i32_0 : i32, i32
  }
  func.func @transform_3(%arg0: i32) -> (i32, i32) {
    %c0_i32 = arith.constant 0 : i32
    %c0_i32_0 = arith.constant 0 : i32
    %c0_i32_1 = arith.constant 0 : i32
    return %c0_i32, %c0_i32_0 : i32, i32
  }
  func.func @transform_4(%arg0: i32) -> (i32, i32) {
    %c0_i32 = arith.constant 0 : i32
    %c0_i32_0 = arith.constant 0 : i32
    %c0_i32_1 = arith.constant 0 : i32
    return %c0_i32, %c0_i32_0 : i32, i32
  }
  func.func @transform_5(%arg0: i32) -> (i32, i32) {
    %c0_i32 = arith.constant 0 : i32
    %c0_i32_0 = arith.constant 0 : i32
    %c0_i32_1 = arith.constant 0 : i32
    return %c0_i32, %c0_i32_0 : i32, i32
  }
  func.func @transform_6(%arg0: i32) -> (i32, i32) {
    %c0_i32 = arith.constant 0 : i32
    %c0_i32_0 = arith.constant 0 : i32
    %c0_i32_1 = arith.constant 0 : i32
    return %c0_i32, %c0_i32_0 : i32, i32
  }
  func.func @transform_7(%arg0: i32) -> (i32, i32) {
    %c0_i32 = arith.constant 0 : i32
    %c0_i32_0 = arith.constant 0 : i32
    return %c0_i32, %arg0 : i32, i32
  }
}

</mosaic_0001>

<bundles_post_ra>
// kernel: tpu_custom_call.1
= control target key start
LH: loop header
LB: loop body
LE: loop exit
PB: predicated region body
PF: predicated region fallthrough
CT: control target
= control target key end

     0   :  { %vm36_vm0 = vcmask 64512   ;;  %v379_v2 = vmov 0.0   ;;  %vm380_vm1 = vmmov 0   ;;  %s451_s0 = inlined_call_operand.vmem [shape: f32[8,8], index: 0, kind: input, shape index: {}]   ;;  %s452_s1 = inlined_call_operand.vmem [shape: f32[8,16], index: 1, kind: input, shape index: {}]   ;;  %s453_s2 = inlined_call_operand.vmem [shape: f32[1,16], index: 2, kind: input, shape index: {}]   ;;  %s454_s3 = inlined_call_operand.vmem [shape: f32[16,8], index: 3, kind: input, shape index: {}]   ;;  %s455_s4 = inlined_call_operand.vmem [shape: f32[1,8], index: 4, kind: input, shape index: {}]   ;;  %s456_s5 = inlined_call_operand.vmem [shape: f32[8,2], index: 5, kind: input, shape index: {}]   ;;  %s457_s6 = inlined_call_operand.vmem [shape: f32[1,2], index: 6, kind: input, shape index: {}]   ;;  %s458_s7 = inlined_call_operand.hbm [shape: f32[2,8], index: 7, kind: output, shape index: {}]  }
   0x1   :  { %v28_v0 = vld [vmem:[%s452_s1] sm:$0xff]  ;;  %337 = vmatprep.subr.mxu0 %v379_v2  ;;  %339 = vmatprep.mubr.msk.f32.mxu0 %vm380_vm1, %v379_v2 }
   0x2   :  { %v27_v1 = vld [vmem:[%s451_s0] sm:$0xff] }
   0x3   :  { %12 = vsyncpa [#allocation3], 0  ;;  %338 = vmatpush3.msra.mxu0 %v28_v0  ;;  %342 = vmatprep.subr.mxu1 %v379_v2  ;;  %v112_v3 = vld [vmem:[%s454_s3 + $0x8] sm:$0xff]  ;;  %v111_v4 = vld [vmem:[%s454_s3] sm:$0xff]  ;;  %vm120_vm2 = vcmask 130048   ;;  %vm308_vm3 = vcmask 58368  }
   0x4   :  { %340 = vmatmul.mubr.msk.f32.vlgmr.msra.gmra.mxu0 %vm36_vm0, %v27_v1  ;;  %346 = vmatprep.mubr.msk.f32.mxu1 %vm380_vm1, %v379_v2  ;;  %v324_v5 = vld [vmem:[%s453_s2] ss:$0 sm:$0xff] }
   0x5   :  { %349 = vmatprep.subr.mxu0 %v379_v2  ;;  %351 = vmatprep.mubr.msk.f32.mxu0 %vm380_vm1, %v379_v2  ;;  %v195_v10 = vld [vmem:[%s456_s5] sm:$0xff]  ;;  %s381_s5 = smov [#allocation2]  }
   0x6   :  { %343 = vmatpush3.msra.mxu1 %v112_v3  ;;  %350 = vmatpush3.msra.mxu0 %v195_v10  ;;  %v326_v11 = vld [vmem:[%s455_s4] ss:$0 sm:$0xff]  ;;  %s316_s13 = sshll.u32 %s381_s5, 4  ;;  %s317_s13 = int_to_ptr.vmem [resolvable:$true] %s316_s13 }
   0x7   :  { %344 = vmatprep.subr.mxu1 %v379_v2  ;;  %v328_v16 = vld [vmem:[%s457_s6] ss:$0 sm:$0xff]  ;;  %s357_s4 = scalar_lea.vmem %s317_s13, 32  ;;  %p362_p1 = scmp.lt.s32.totalorder %s317_s13, %s317_s13 }
   0x8   :  { %345 = vmatpush3.msra.mxu1 %v111_v4  ;;  %p358_p0 = scmp.ne.s32.totalorder %s317_s13, %s357_s4  ;;  %p363_p2 = scmp.lt.s32.totalorder %s357_s4, %s357_s4 }
   0xa   :  { %p364_p3 = por %p363_p2, %p362_p1 }
   0xc   :  { %p365_p4 = pnand %p364_p3, %p358_p0 }
  0xc4   :  { %v106_v6 = vpop.f32.mrf.mxu0 }
  0xc5   :  { %v107_v7 = vadd.f32 %v324_v5, %v106_v6 }
  0xc6   :  { %v341_v8 = vpop.f32.mrf.mxu0 }
  0xc7   :  { %v110_v9 = vmax.f32 %v107_v7, 0.0 }
  0xc9   :  { %347 = vmatmul.mubr.msk.f32.vlgmr.msra.gmra.mxu1 %vm120_vm2, %v110_v9 }
 0x189   :  { %v190_v12 = vpop.f32.mrf.mxu1 }
 0x18a   :  { %v191_v13 = vadd.f32 %v326_v11, %v190_v12 }
 0x18b   :  { %v348_v14 = vpop.f32.mrf.mxu1 }
 0x18c   :  { %v194_v15 = vmax.f32 %v191_v13, 0.0 }
 0x18e   :  { %352 = vmatmul.mubr.msk.f32.vlgmr.msra.gmra.mxu0 %vm36_vm0, %v194_v15 }
 0x24e   :  { %v272_v17 = vpop.f32.mrf.mxu0 }
 0x24f   :  { %v273_v18 = vadd.f32 %v328_v16, %v272_v17 }
 0x250   :  { %v353_v19 = vpop.f32.mrf.mxu0 }
 0x251   :  { %276 = vxpose.xlu0.b32.start.end [1/1] (short) (narrow) %v273_v18, 8 }
 0x2cd   :  { %v292_v20 = vpop.trf.xlu0 }
 0x2ce   :  { %309 = vst.msk [vmem:[#allocation2] sm:$0x3] %vm308_vm3, %v292_v20 }
 0x2cf   :  { %368 = shalt.err (!%p365_p4)
}
 0x2d0   :  { %319 = dma.vmem_to_hbm [thread:$0]  %s317_s13, 32, %s458_s7, [#allocation3]  }
 0x2d1   :  { %377 = dma.done.wait [#allocation3], 32  }
 0x2d2   :  { %378 = vsyncadd [#allocation3], 4294967264 }
 0x2d3   :  { %323 = vsyncpa [#allocation3], 1 }

</bundles_post_ra>
